<compile_context>
chip_gen: v7x
topology: tpu7x:2x2x1
jax: 0.10.0
libtpu: 0.0.40
codegen_flags: <defaults>
</compile_context>

<pallas_src>
import functools

import jax
import jax.numpy as jnp
from jax.experimental import pallas as pl
from jax.experimental.pallas import tpu as pltpu

LANE = 128                 # vreg lane width
MAX_ROWS_PER_TILE = 8192   # 4 MiB per f32 operand tile (16 MiB double-buffered in+out)


def _tanh_kernel(x_ref, o_ref, *, compute_dtype):
    # tanh lowers to the EUP; compute dtype is chosen per-generation in the wrapper.
    y = jnp.tanh(x_ref[...].astype(compute_dtype))
    o_ref[...] = y.astype(o_ref.dtype)


def _round_up(x, m):
    return ((x + m - 1) // m) * m


def _packed_sublanes(dtype):
    # Sub-32-bit dtypes pack along sublanes: 8 rows f32, 16 bf16, 32 int8/fp8.
    itemsize = jnp.dtype(dtype).itemsize
    return 8 * max(1, 4 // max(1, itemsize))


def _compute_dtype(dtype):
    if dtype == jnp.float32:
        return jnp.float32
    if dtype == jnp.bfloat16:
        try:
            kind = jax.devices()[0].device_kind.lower()
        except Exception:
            kind = ""
        # v6e / v7x have bf16 VPU/EUP; older generations (v5e) need f32 compute.
        if ("v6" in kind) or ("v7" in kind) or ("7x" in kind):
            return jnp.bfloat16
    return jnp.float32


def _pick_tile_rows(rows, packed):
    # Tiny inputs: single step (latency-dominated, per-step overhead dominates).
    if rows <= 512:
        return rows
    # Mid/large: aim for >=4 grid steps (pipelining + v7x dual-TC), capped by
    # the per-operand VMEM tile budget.
    return min(MAX_ROWS_PER_TILE, _round_up(pl.cdiv(rows, 4), packed))


def pallas_tanh(x):
    """Elementwise tanh(x) on TPU via a single Pallas kernel (HBM-roofline path)."""
    orig_shape, orig_dtype = x.shape, x.dtype
    flat = x.reshape(-1)
    n = flat.shape[0]
    if n == 0:
        return x

    packed = _packed_sublanes(orig_dtype)
    chunk = packed * LANE                 # minimum lane/sublane-aligned unit
    n_main = (n // chunk) * chunk

    if n_main == 0:
        # Smaller than one packed vreg tile: not worth a kernel launch.
        return jnp.tanh(x)

    rows = n_main // LANE                 # multiple of `packed` by construction
    tm = _pick_tile_rows(rows, packed)
    grid = (pl.cdiv(rows, tm),)           # partial edge block is masked by Pallas

    x2 = flat[:n_main].reshape(rows, LANE)  # zero-copy lane-dense view of the prefix
    itemsize = jnp.dtype(orig_dtype).itemsize

    main_out = pl.pallas_call(
        functools.partial(_tanh_kernel, compute_dtype=_compute_dtype(orig_dtype)),
        out_shape=jax.ShapeDtypeStruct((rows, LANE), orig_dtype),
        grid_spec=pltpu.PrefetchScalarGridSpec(
            num_scalar_prefetch=0,
            grid=grid,
            in_specs=[pl.BlockSpec((tm, LANE), lambda i: (i, 0))],
            out_specs=pl.BlockSpec((tm, LANE), lambda i: (i, 0)),
        ),
        compiler_params=pltpu.CompilerParams(
            dimension_semantics=("parallel",),
            vmem_limit_bytes=32 << 20,    # keeps 4 MiB tiles legal on v5e too
        ),
        cost_estimate=pl.CostEstimate(
            flops=0,
            transcendentals=n_main,
            bytes_accessed=2 * n_main * itemsize,
        ),
    )(x2)

    if n_main == n:
        return main_out.reshape(orig_shape)

    # Misaligned tail (< packed*128 elements): plain XLA tanh; the aligned bulk
    # is never padded, sliced, or re-streamed through HBM.
    tail = jnp.tanh(flat[n_main:])
    return jnp.concatenate([main_out.reshape(-1), tail]).reshape(orig_shape)


if __name__ == "__main__":
    key = jax.random.PRNGKey(0)
    x = jax.random.normal(key, (2, 4, 16, 16), jnp.float32)

    y = pallas_tanh(x)
    y = jax.block_until_ready(y)

    ref = jnp.tanh(x)
    assert y.shape == x.shape
    assert y.dtype == x.dtype
    assert bool(jnp.max(jnp.abs(y - ref)) < 1e-5)

    # Also exercise a misaligned size (tail path) and a multi-tile size.
    x2 = jax.random.normal(jax.random.PRNGKey(1), (3, 7, 13), jnp.float32)
    y2 = jax.block_until_ready(pallas_tanh(x2))
    assert bool(jnp.max(jnp.abs(y2 - jnp.tanh(x2))) < 1e-5)

    x3 = jax.random.normal(jax.random.PRNGKey(2), (8, 1024, 129), jnp.float32)
    y3 = jax.block_until_ready(pallas_tanh(x3))
    assert bool(jnp.max(jnp.abs(y3 - jnp.tanh(x3))) < 1e-5)

    print("KERNEL_OK")
</pallas_src>

<mosaic_0001>
module attributes {stable_mosaic.version = 11 : i64} {
  func.func @_tanh_kernel(%arg0: i32, %arg1: memref<16x128xf32, #tpu.memory_space<vmem>>, %arg2: memref<16x128xf32, #tpu.memory_space<vmem>>) attributes {dimension_semantics = [#tpu.dimension_semantics<parallel>], iteration_bounds = array<i64: 1>, scalar_prefetch = 0 : i64, scratch_operands = 0 : i64, tpu.core_type = #tpu.core_type<tc>, window_params = [{transform_indices = @transform_0, window_bounds = array<i64: 16, 128>}, {transform_indices = @transform_1, window_bounds = array<i64: 16, 128>}]} {
    %c0 = arith.constant 0 : index
    %c0_0 = arith.constant 0 : index
    %0 = vector.load %arg1[%c0, %c0_0] : memref<16x128xf32, #tpu.memory_space<vmem>>, vector<16x128xf32>
    %1 = math.tanh %0 : vector<16x128xf32>
    %c0_1 = arith.constant 0 : index
    %c0_2 = arith.constant 0 : index
    %2 = vector.load %arg2[%c0_1, %c0_2] : memref<16x128xf32, #tpu.memory_space<vmem>>, vector<16x128xf32>
    tpu.vector_store %arg2[%c0_1, %c0_2], %1 {strides = array<i32>} : memref<16x128xf32, #tpu.memory_space<vmem>>, vector<16x128xf32>,
    return
  }
  func.func @transform_0(%arg0: i32) -> (i32, i32) {
    %c0_i32 = arith.constant 0 : i32
    %c0_i32_0 = arith.constant 0 : i32
    return %arg0, %c0_i32 : i32, i32
  }
  func.func @transform_1(%arg0: i32) -> (i32, i32) {
    %c0_i32 = arith.constant 0 : i32
    %c0_i32_0 = arith.constant 0 : i32
    return %arg0, %c0_i32 : i32, i32
  }
}

</mosaic_0001>

<bundles_post_ra>
// kernel: tpu_custom_call.1
= control target key start
LH: loop header
LB: loop body
LE: loop exit
PB: predicated region body
PF: predicated region fallthrough
CT: control target
= control target key end

     0   :  { %6 = vsyncpa [#allocation3], 0  ;;  %s146_s0 = inlined_call_operand.hbm [shape: f32[16,128], index: 0, kind: input, shape index: {}]   ;;  %s147_s1 = inlined_call_operand.hbm [shape: f32[16,128], index: 1, kind: output, shape index: {}]  }
   0x1   :  { %7 = vsyncpa [#allocation4], 0  ;;  %s102_s6 = smov [#allocation2]   ;;  %s54_s10 = scalar_lea.hbm %s146_s0, 256 }
   0x2   :  { %s13_s7 = sshll.u32 %s102_s6, 4  ;;  %p55_p0 = scmp.ne.s32.totalorder %s146_s0, %s54_s10  ;;  %s14_s7 = int_to_ptr.vmem [resolvable:$true] %s13_s7 }
   0x3   :  { %p58_p1 = scmp.lt.u32.totalorder %s54_s10, %s146_s0 }
   0x5   :  { %p60_p2 = pnand %p58_p1, %p55_p0 }
   0x7   :  { %63 = shalt.err (!%p60_p2)
}
   0x8   :  { %s64_s15 = scalar_lea.vmem %s14_s7, 256  ;;  %p69_p4 = scmp.lt.s32.totalorder %s14_s7, %s14_s7 }
   0x9   :  { %p65_p3 = scmp.ne.s32.totalorder %s14_s7, %s64_s15  ;;  %p70_p5 = scmp.lt.s32.totalorder %s64_s15, %s64_s15 }
   0xb   :  { %p71_p6 = por %p70_p5, %p69_p4 }
   0xd   :  { %p72_p7 = pnand %p71_p6, %p65_p3 }
   0xf   :  { %75 = shalt.err (!%p72_p7)
}
  0x10   :  { %s103_s16 = smov 128   ;;  %s104_s17 = smov 8  }
  0x11   :  { %19 = dma.hbm_to_vmem [thread:$0]  %s146_s0, 256, %s14_s7, [#allocation3], %s103_s16, %s103_s16, %s104_s17  }
  0x12   :  { %98 = dma.done.wait [#allocation3], 256  }
  0x13   :  { %99 = vsyncadd [#allocation3], 4294967040  ;;  %v23_v0 = vld [vmem:[#allocation2] sm:$0xff]  ;;  %v24_v1 = vld [vmem:[#allocation2 + $0x8] sm:$0xff]  ;;  %s105_s20 = smov [#allocation5]  }
  0x14   :  { %50 = vtanh.f32 %v23_v0  ;;  %s34_s21 = sshll.u32 %s105_s20, 4  ;;  %s35_s21 = int_to_ptr.vmem [resolvable:$true] %s34_s21 }
  0x15   :  { %52 = vtanh.f32 %v24_v1  ;;  %s76_s22 = scalar_lea.vmem %s35_s21, 256  ;;  %p81_p9 = scmp.lt.s32.totalorder %s35_s21, %s35_s21 }
  0x16   :  { %p77_p8 = scmp.ne.s32.totalorder %s35_s21, %s76_s22  ;;  %p82_p10 = scmp.lt.s32.totalorder %s76_s22, %s76_s22 }
  0x18   :  { %p83_p11 = por %p82_p10, %p81_p9 }
  0x1a   :  { %p84_p12 = pnand %p83_p11, %p77_p8 }
  0x1e   :  { %v51_v2 = vpop.eup %50 }
  0x1f   :  { %v53_v3 = vpop.eup %52  ;;  %27 = vst [vmem:[#allocation5] sm:$0xff] %v51_v2 }
  0x20   :  { %28 = vst [vmem:[#allocation5 + $0x8] sm:$0xff] %v53_v3 }
  0x21   :  { %87 = shalt.err (!%p84_p12)
}
  0x22   :  { %s88_s24 = scalar_lea.hbm %s147_s1, 256 }
  0x23   :  { %p89_p13 = scmp.ne.s32.totalorder %s147_s1, %s88_s24  ;;  %p92_p0 = scmp.lt.u32.totalorder %s88_s24, %s147_s1 }
  0x25   :  { %p94_p1 = pnand %p92_p0, %p89_p13 }
  0x27   :  { %97 = shalt.err (!%p94_p1)
}
  0x28   :  { %40 = dma.vmem_to_hbm [thread:$0]  %s35_s21, 256, %s147_s1, [#allocation4], %s103_s16, %s103_s16, %s104_s17  }
  0x29   :  { %100 = dma.done.wait [#allocation4], 256  }
  0x2a   :  { %101 = vsyncadd [#allocation4], 4294967040 }
  0x2b   :  { %44 = vsyncpa [#allocation3], 1 }
  0x2c   :  { %45 = vsyncpa [#allocation4], 1 }

</bundles_post_ra>
